<compile_context>
chip_gen: v7x
topology: tpu7x:2x2x1
jax: 0.10.0
libtpu: 0.0.40
codegen_flags: <defaults>
</compile_context>

<pallas_src>
import functools
import math

import jax
import jax.numpy as jnp
from jax import lax
from jax.experimental import pallas as pl
from jax.experimental.pallas import tpu as pltpu

_LANE = 128
_PAD_LABEL = jnp.iinfo(jnp.int32).min   # sentinel for padded contrast columns


def _round_up(x, m):
    return (x + m - 1) // m * m


def _tile_loss(m, anchor_f, contrast_t, *, temperature, base_temperature,
               n_valid_cols, m_includes_diag):
    """Per-anchor loss for one (TM, Bc) tile.

    m:          [TM, Bc] f32 positive weights (self pair included iff
                m_includes_diag; padded columns must already be zero).
    anchor_f:   [TM, Dp] normalized anchor features (compute dtype).
    contrast_t: [Dp, Bc] normalized contrast features, pre-transposed.
    Returns     [TM, 1] f32 per-anchor loss.
    """
    tm = anchor_f.shape[0]
    bc = contrast_t.shape[1]
    padded = n_valid_cols < bc

    # Similarity tile on the MXU (f32 accumulation).
    sim = lax.dot_general(
        anchor_f, contrast_t,
        dimension_numbers=(((1,), (0,)), ((), ())),
        preferred_element_type=jnp.float32,
    ) * (1.0 / temperature)                                      # [TM, Bc]

    if padded:
        col_valid = jnp.broadcast_to(
            lax.broadcasted_iota(jnp.int32, (1, bc), 1) < n_valid_cols,
            (tm, bc))

    # Features are L2-normalised, so the self-similarity (== 1/temperature) is
    # the row max; zero-padded columns (sim == 0) can never exceed it.
    row_max = jnp.max(sim, axis=1, keepdims=True)
    shifted = sim - row_max                                      # <= 0, rowmax == 0
    shifted_min_src = jnp.where(col_valid, shifted, 0.0) if padded else shifted
    lmin = jnp.min(shifted_min_src, axis=1, keepdims=True)
    # Reference rescale: (logits - lmin) / (lmax - lmin) with lmax == 0.  Keep
    # this reciprocal exact so the rescaled self-logit stays 1.0 to 1 ulp (the
    # analytic diagonal removal below relies on it).
    inv_range = pl.reciprocal(-lmin, approx=False)
    logits = (shifted - lmin) * inv_range                        # in [0, 1]

    # Softmax denominator excluding the self column: the rescaled self-logit is
    # exactly 1, so subtract e instead of materialising a (TM, Bc) diag mask.
    ex = jnp.exp(logits)
    if padded:
        ex = jnp.where(col_valid, ex, 0.0)
    denom = jnp.sum(ex, axis=1, keepdims=True) - math.e
    log_denom = jnp.log(denom)

    s_m = jnp.sum(m, axis=1, keepdims=True)
    s_ml = jnp.sum(m * logits, axis=1, keepdims=True)
    if m_includes_diag:
        # Drop the self pair: its weight is 1 and its rescaled logit is 1.
        s_m = s_m - 1.0
        s_ml = s_ml - 1.0

    # sum(m * log_prob) == sum(m * logits) - log_denom * sum(m);
    # reference divides by (sum(m) + 1).
    mean_log_prob_pos = (s_ml - log_denom * s_m) * pl.reciprocal(
        s_m + 1.0, approx=True)
    return (-(temperature / base_temperature)) * mean_log_prob_pos  # [TM, 1]


def _supcon_labels_kernel(alab_ref, clab_ref, af_ref, ct_ref, out_ref, *,
                          temperature, base_temperature, n_valid_cols):
    tm = af_ref.shape[0]
    bc = clab_ref.shape[1]
    a = jnp.broadcast_to(alab_ref[...], (tm, bc))        # (TM,1) -> (TM,Bc)
    c = jnp.broadcast_to(clab_ref[...], (tm, bc))        # (1,Bc) -> (TM,Bc)
    pos = (a == c).astype(jnp.float32)                   # includes the diagonal;
                                                         # padded cols: sentinel -> 0
    loss = _tile_loss(pos, af_ref[...], ct_ref[...],
                      temperature=temperature, base_temperature=base_temperature,
                      n_valid_cols=n_valid_cols, m_includes_diag=True)
    out_ref[...] = jnp.broadcast_to(loss, out_ref.shape)  # lane-dense store


def _supcon_mask_kernel(mask_ref, af_ref, ct_ref, out_ref, *,
                        temperature, base_temperature, n_valid_cols):
    m = mask_ref[...].astype(jnp.float32)                # diag zeroed in wrapper
    loss = _tile_loss(m, af_ref[...], ct_ref[...],
                      temperature=temperature, base_temperature=base_temperature,
                      n_valid_cols=n_valid_cols, m_includes_diag=False)
    out_ref[...] = jnp.broadcast_to(loss, out_ref.shape)


def _device_kind():
    try:
        return jax.devices()[0].device_kind.lower()
    except Exception:
        return ""


def _pick_tile_m(batch):
    kind = _device_kind()
    cap = 256                               # MXU-native M on v6e / v7x
    if "v5 lite" in kind or "v5e" in kind:
        cap = 128                           # 4x128x128 MXU on v5e
    elif "v7" in kind and batch >= 8192:
        cap = 128                           # v7x: 64 MiB VMEM/TC -> shrink (TM,Bc) temporaries
    if batch >= cap:
        return cap
    return _round_up(batch, 8)


def _vmem_limit_bytes(est):
    try:
        phys = int(pltpu.get_tpu_info().vmem_capacity_bytes)
    except Exception:
        phys = 64 << 20                     # conservative: v7x has 64 MiB per TensorCore
    cap = max(phys - (8 << 20), 16 << 20)   # headroom for Mosaic-internal scratch
    return int(min(max(est, 32 << 20), cap))


def supcon_loss(features, labels=None, mask=None, temperature=0.07,
                contrast_mode='one', base_temperature=0.07, compute_dtype=None):
    """features: [B, D] floats. labels: optional [B] ints. mask: optional [B, B]."""
    assert contrast_mode == 'one', "only contrast_mode='one' implemented"
    # TODO(synk): contrast_mode='all' / multi-view (3-D features) path not
    # implemented (the reference 3-D path relies on deprecated .T semantics).
    features = jnp.asarray(features)
    if features.ndim != 2:
        raise ValueError('expected 2-D [batch, dim] features')
    B, D = features.shape
    if labels is not None and mask is not None:
        raise ValueError('Cannot define both labels and mask')

    if compute_dtype is None:
        compute_dtype = features.dtype
        if features.dtype == jnp.float32 and B >= 4096:
            # Big batches: bf16 features halve resident VMEM and run the MXU at
            # its native rate; accumulation stays f32.
            compute_dtype = jnp.bfloat16

    # One shared L2 normalisation (anchor == contrast side) in f32.
    f32 = features.astype(jnp.float32)
    norm = jnp.sqrt(jnp.sum(f32 * f32, axis=1, keepdims=True))
    fnorm = (f32 / jnp.maximum(norm, 1e-12)).astype(compute_dtype)

    # Lane-align the feature (K) and contrast (N) axes.
    Dp = max(_LANE, _round_up(D, _LANE))
    if Dp != D:
        fnorm = jnp.pad(fnorm, ((0, 0), (0, Dp - D)))
    Bc = max(_LANE, _round_up(B, _LANE))

    TM = _pick_tile_m(B)
    Bp = _round_up(B, TM)
    anchors = fnorm if Bp == B else jnp.pad(fnorm, ((0, Bp - B), (0, 0)))
    # Pre-transpose the contrast side once to (Dp, Bc): standard (M,K)x(K,N)
    # contraction, no per-grid-step transpose of the resident tile.
    contrast_t = fnorm.T
    if Bc != B:
        contrast_t = jnp.pad(contrast_t, ((0, 0), (0, Bc - B)))
    grid = (Bp // TM,)

    itemsize = jnp.dtype(compute_dtype).itemsize
    # single-buffered contrast + double-buffered anchor/mask/out blocks + live
    # (TM, Bc) f32 temporaries, with margin.
    est = (Dp * Bc * itemsize + 2 * TM * Dp * itemsize + 2 * TM * 128 * 4
           + 2 * TM * Bc * 2 + 6 * TM * Bc * 4)
    vmem_limit = _vmem_limit_bytes(int(1.25 * est) + (2 << 20))
    # TODO(synk): for very large B (contrast residency + (TM, Bc) temporaries
    # past the per-core VMEM budget, hit first on v7x) add a column-tiled
    # two-pass scheme (pass 1: rowmin, pass 2: denom / positive sums).
    cp = pltpu.CompilerParams(dimension_semantics=("parallel",),
                              vmem_limit_bytes=vmem_limit)
    out_shape = jax.ShapeDtypeStruct((Bp, 128), jnp.float32)
    out_spec = pl.BlockSpec((TM, 128), lambda i: (i, 0))
    anchor_spec = pl.BlockSpec((TM, Dp), lambda i: (i, 0))

    def contrast_spec(single_buffer):
        # Grid-invariant block: single VMEM buffer (copied once, never re-DMA'd).
        if single_buffer:
            return pl.BlockSpec((Dp, Bc), lambda i: (0, 0),
                                pipeline_mode=pl.Buffered(1))
        return pl.BlockSpec((Dp, Bc), lambda i: (0, 0))

    if mask is not None:
        # Explicit-mask path.  Prefer the `labels` path when the mask is
        # label-derived: it avoids streaming a [B, B] mask from HBM entirely.
        mask = jnp.asarray(mask, jnp.float32)
        if mask.shape != (B, B):
            raise ValueError('mask must be [batch, batch]')
        ridx = jnp.arange(B)
        mask = jnp.where(ridx[:, None] == ridx[None, :], 0.0, mask)  # drop diag once
        mask = mask.astype(jnp.bfloat16)      # 2x less HBM traffic than f32
        mask = jnp.pad(mask, ((0, Bp - B), (0, Bc - B)))
        kernel = functools.partial(_supcon_mask_kernel,
                                   temperature=float(temperature),
                                   base_temperature=float(base_temperature),
                                   n_valid_cols=B)

        def call(single_buffer):
            return pl.pallas_call(
                kernel, out_shape=out_shape, grid=grid,
                in_specs=[pl.BlockSpec((TM, Bc), lambda i: (i, 0)),  # mask rows
                          anchor_spec,
                          contrast_spec(single_buffer)],
                out_specs=out_spec, compiler_params=cp,
            )(mask, anchors, contrast_t)
    else:
        if labels is None:
            labels = jnp.arange(B, dtype=jnp.int32)   # mask == eye(B)
        else:
            labels = jnp.asarray(labels, jnp.int32).reshape(-1)
            if labels.shape[0] != B:
                raise ValueError('Num of labels does not match num of features')
        alab = labels.reshape(B, 1)
        if Bp != B:
            # Padded anchor rows are discarded from the final mean.
            alab = jnp.pad(alab, ((0, Bp - B), (0, 0)), constant_values=_PAD_LABEL)
        clab = labels.reshape(1, B)
        if Bc != B:
            # Sentinel labels: padded contrast columns are never positives.
            clab = jnp.pad(clab, ((0, 0), (0, Bc - B)), constant_values=_PAD_LABEL)
        kernel = functools.partial(_supcon_labels_kernel,
                                   temperature=float(temperature),
                                   base_temperature=float(base_temperature),
                                   n_valid_cols=B)

        def call(single_buffer):
            return pl.pallas_call(
                kernel, out_shape=out_shape, grid=grid,
                in_specs=[pl.BlockSpec((TM, 1), lambda i: (i, 0)),   # anchor labels
                          pl.BlockSpec((1, Bc), lambda i: (0, 0)),   # contrast labels
                          anchor_spec,
                          contrast_spec(single_buffer)],
                out_specs=out_spec, compiler_params=cp,
            )(alab, clab, anchors, contrast_t)

    try:
        per_anchor = call(True)
    except Exception:
        # This JAX build rejects pl.Buffered(1): fall back to double-buffering.
        per_anchor = call(False)

    # anchor_count == 1: mean over the B valid anchors (padded rows dropped).
    return jnp.mean(per_anchor[:B, 0])


def _supcon_loss_ref(features, mask, temperature=0.07, base_temperature=0.07):
    """Pure-JAX reference mirroring the PyTorch module."""
    f = features / jnp.maximum(
        jnp.linalg.norm(features, axis=1, keepdims=True), 1e-12)
    B = f.shape[0]
    sim = (f @ f.T) / temperature
    logits = sim - jnp.max(sim, axis=1, keepdims=True)
    lmin = jnp.min(logits, axis=1, keepdims=True)
    lmax = jnp.max(logits, axis=1, keepdims=True)
    logits = (logits - lmin) / (lmax - lmin)
    logits_mask = 1.0 - jnp.eye(B)
    m = mask * logits_mask
    exp_logits = jnp.exp(logits) * logits_mask
    log_prob = logits - jnp.log(jnp.sum(exp_logits, axis=1, keepdims=True))
    mean_log_prob_pos = jnp.sum(m * log_prob, axis=1) / (jnp.sum(m, axis=1) + 1.0)
    return jnp.mean(-(temperature / base_temperature) * mean_log_prob_pos)


if __name__ == "__main__":
    key = jax.random.PRNGKey(0)
    B, D = 8, 32
    features = jax.random.normal(key, (B, D), dtype=jnp.float32)
    labels = jnp.array([0, 1, 0, 1, 2, 2, 3, 3], dtype=jnp.int32)
    mask_ref = (labels[:, None] == labels[None, :]).astype(jnp.float32)
    expected = _supcon_loss_ref(features, mask_ref)

    # 1) labels path (positive mask computed in-kernel), f32 features.
    loss = jax.block_until_ready(supcon_loss(features, labels=labels))
    assert jnp.allclose(loss, expected, rtol=2e-3, atol=1e-5), (loss, expected)

    # 2) explicit-mask path (bf16 mask stream).
    loss_m = jax.block_until_ready(supcon_loss(features, mask=mask_ref))
    assert jnp.allclose(loss_m, expected, rtol=2e-3, atol=1e-5), (loss_m, expected)

    # 3) no-label path (mask = eye -> loss == 0 by construction).
    loss0 = jax.block_until_ready(supcon_loss(features))
    assert jnp.allclose(loss0, 0.0, atol=1e-5), loss0

    # 4) bf16 feature path (native-rate MXU); loose tolerance per bf16 precision.
    loss_bf16 = jax.block_until_ready(
        supcon_loss(features.astype(jnp.bfloat16), labels=labels))
    assert jnp.allclose(loss_bf16, expected, rtol=1e-1, atol=1e-1), (
        loss_bf16, expected)

    print("KERNEL_OK")
</pallas_src>

<mosaic_0001>
module attributes {stable_mosaic.version = 11 : i64} {
  func.func @_supcon_labels_kernel(%arg0: i32, %arg1: memref<8x1xi32, #tpu.memory_space<vmem>>, %arg2: memref<1x128xi32, #tpu.memory_space<vmem>>, %arg3: memref<8x128xf32, #tpu.memory_space<vmem>>, %arg4: memref<128x128xf32, #tpu.memory_space<vmem>>, %arg5: memref<8x128xf32, #tpu.memory_space<vmem>>) attributes {dimension_semantics = [#tpu.dimension_semantics<parallel>], iteration_bounds = array<i64: 1>, scalar_prefetch = 0 : i64, scratch_operands = 0 : i64, tpu.core_type = #tpu.core_type<tc>, window_params = [{transform_indices = @transform_0, window_bounds = array<i64: 8, 1>}, {pipeline_mode = #tpu.pipeline_mode<synchronous>, transform_indices = @transform_1, window_bounds = array<i64: 1, 128>}, {transform_indices = @transform_2, window_bounds = array<i64: 8, 128>}, {pipeline_mode = #tpu.pipeline_mode<synchronous>, transform_indices = @transform_3, window_bounds = array<i64: 128, 128>}, {transform_indices = @transform_4, window_bounds = array<i64: 8, 128>}]} {
    %c0 = arith.constant 0 : index
    %c0_0 = arith.constant 0 : index
    %0 = vector.load %arg1[%c0, %c0_0] : memref<8x1xi32, #tpu.memory_space<vmem>>, vector<8x1xi32>
    %1 = vector.shape_cast %0 : vector<8x1xi32> to vector<8x1xi32>
    %2 = vector.broadcast %1 : vector<8x1xi32> to vector<8x128xi32>
    %c0_1 = arith.constant 0 : index
    %c0_2 = arith.constant 0 : index
    %3 = vector.load %arg2[%c0_1, %c0_2] : memref<1x128xi32, #tpu.memory_space<vmem>>, vector<1x128xi32>
    %4 = vector.shape_cast %3 : vector<1x128xi32> to vector<1x128xi32>
    %5 = vector.broadcast %4 : vector<1x128xi32> to vector<8x128xi32>
    %6 = arith.cmpi eq, %2, %5 : vector<8x128xi32>
    %7 = arith.extui %6 : vector<8x128xi1> to vector<8x128xi32>
    %8 = arith.sitofp %7 : vector<8x128xi32> to vector<8x128xf32>
    %c0_3 = arith.constant 0 : index
    %c0_4 = arith.constant 0 : index
    %9 = vector.load %arg3[%c0_3, %c0_4] : memref<8x128xf32, #tpu.memory_space<vmem>>, vector<8x128xf32>
    %c0_5 = arith.constant 0 : index
    %c0_6 = arith.constant 0 : index
    %10 = vector.load %arg4[%c0_5, %c0_6] : memref<128x128xf32, #tpu.memory_space<vmem>>, vector<128x128xf32>
    %cst = arith.constant dense<0.000000e+00> : vector<8x128xf32>
    %11 = tpu.matmul %9, %10, %cst {dimension_numbers = #tpu.dot_dimension_numbers<[1], [0], [0], [1], [0, 0, 1, 1], [], []>} : vector<8x128xf32>, vector<128x128xf32>, vector<8x128xf32> -> vector<8x128xf32>
    %cst_7 = arith.constant 14.2857141 : f32
    %12 = vector.broadcast %cst_7 : f32 to vector<8x128xf32>
    %13 = arith.mulf %11, %12 : vector<8x128xf32>
    %14 = tpu.iota {dimensions = array<i32: 1>} : vector<1x128xi32>
    %c8_i32 = arith.constant 8 : i32
    %15 = vector.broadcast %c8_i32 : i32 to vector<1x128xi32>
    %16 = arith.cmpi slt, %14, %15 : vector<1x128xi32>
    %17 = vector.shape_cast %16 : vector<1x128xi1> to vector<1x128xi1>
    %18 = vector.broadcast %17 : vector<1x128xi1> to vector<8x128xi1>
    %cst_8 = arith.constant dense<0xFF800000> : vector<8xf32>
    %19 = vector.multi_reduction <maximumf>, %13, %cst_8 [1] : vector<8x128xf32> to vector<8xf32>
    %20 = vector.shape_cast %19 : vector<8xf32> to vector<8x1xf32>
    %21 = vector.broadcast %20 : vector<8x1xf32> to vector<8x128xf32>
    %22 = arith.subf %13, %21 : vector<8x128xf32>
    %cst_9 = arith.constant 0.000000e+00 : f32
    %23 = vector.broadcast %cst_9 : f32 to vector<8x128xf32>
    %24 = arith.select %18, %22, %23 : vector<8x128xi1>, vector<8x128xf32>
    %cst_10 = arith.constant dense<0x7F800000> : vector<8xf32>
    %25 = vector.multi_reduction <minimumf>, %24, %cst_10 [1] : vector<8x128xf32> to vector<8xf32>
    %26 = vector.shape_cast %25 : vector<8xf32> to vector<8x1xf32>
    %cst_11 = arith.constant 0.000000e+00 : f32
    %27 = vector.broadcast %cst_11 : f32 to vector<8x1xf32>
    %28 = arith.subf %27, %26 : vector<8x1xf32>
    %29 = tpu.reciprocal %28 : vector<8x1xf32> -> vector<8x1xf32>
    %30 = vector.broadcast %26 : vector<8x1xf32> to vector<8x128xf32>
    %31 = arith.subf %22, %30 : vector<8x128xf32>
    %32 = vector.broadcast %29 : vector<8x1xf32> to vector<8x128xf32>
    %33 = arith.mulf %31, %32 : vector<8x128xf32>
    %34 = math.exp %33 : vector<8x128xf32>
    %cst_12 = arith.constant 0.000000e+00 : f32
    %35 = vector.broadcast %cst_12 : f32 to vector<8x128xf32>
    %36 = arith.select %18, %34, %35 : vector<8x128xi1>, vector<8x128xf32>
    %cst_13 = arith.constant dense<0.000000e+00> : vector<8xf32>
    %37 = vector.multi_reduction <add>, %36, %cst_13 [1] : vector<8x128xf32> to vector<8xf32>
    %38 = vector.shape_cast %37 : vector<8xf32> to vector<8x1xf32>
    %cst_14 = arith.constant 2.71828175 : f32
    %39 = vector.broadcast %cst_14 : f32 to vector<8x1xf32>
    %40 = arith.subf %38, %39 : vector<8x1xf32>
    %41 = math.log %40 : vector<8x1xf32>
    %cst_15 = arith.constant dense<0.000000e+00> : vector<8xf32>
    %42 = vector.multi_reduction <add>, %8, %cst_15 [1] : vector<8x128xf32> to vector<8xf32>
    %43 = vector.shape_cast %42 : vector<8xf32> to vector<8x1xf32>
    %44 = arith.mulf %8, %33 : vector<8x128xf32>
    %cst_16 = arith.constant dense<0.000000e+00> : vector<8xf32>
    %45 = vector.multi_reduction <add>, %44, %cst_16 [1] : vector<8x128xf32> to vector<8xf32>
    %46 = vector.shape_cast %45 : vector<8xf32> to vector<8x1xf32>
    %cst_17 = arith.constant 1.000000e+00 : f32
    %47 = vector.broadcast %cst_17 : f32 to vector<8x1xf32>
    %48 = arith.subf %43, %47 : vector<8x1xf32>
    %cst_18 = arith.constant 1.000000e+00 : f32
    %49 = vector.broadcast %cst_18 : f32 to vector<8x1xf32>
    %50 = arith.subf %46, %49 : vector<8x1xf32>
    %51 = arith.mulf %41, %48 : vector<8x1xf32>
    %52 = arith.subf %50, %51 : vector<8x1xf32>
    %cst_19 = arith.constant 1.000000e+00 : f32
    %53 = vector.broadcast %cst_19 : f32 to vector<8x1xf32>
    %54 = arith.addf %48, %53 : vector<8x1xf32>
    %55 = tpu.reciprocal %54 {approx = true} : vector<8x1xf32> -> vector<8x1xf32>
    %56 = arith.mulf %52, %55 : vector<8x1xf32>
    %cst_20 = arith.constant -1.000000e+00 : f32
    %57 = vector.broadcast %cst_20 : f32 to vector<8x1xf32>
    %58 = arith.mulf %57, %56 : vector<8x1xf32>
    %59 = vector.shape_cast %58 : vector<8x1xf32> to vector<8x1xf32>
    %60 = vector.broadcast %59 : vector<8x1xf32> to vector<8x128xf32>
    %c0_21 = arith.constant 0 : index
    %c0_22 = arith.constant 0 : index
    %61 = vector.load %arg5[%c0_21, %c0_22] : memref<8x128xf32, #tpu.memory_space<vmem>>, vector<8x128xf32>
    tpu.vector_store %arg5[%c0_21, %c0_22], %60 {strides = array<i32>} : memref<8x128xf32, #tpu.memory_space<vmem>>, vector<8x128xf32>,
    return
  }
  func.func @transform_0(%arg0: i32) -> (i32, i32) {
    %c0_i32 = arith.constant 0 : i32
    %c0_i32_0 = arith.constant 0 : i32
    return %arg0, %c0_i32 : i32, i32
  }
  func.func @transform_1(%arg0: i32) -> (i32, i32) {
    %c0_i32 = arith.constant 0 : i32
    %c0_i32_0 = arith.constant 0 : i32
    %c0_i32_1 = arith.constant 0 : i32
    return %c0_i32, %c0_i32_0 : i32, i32
  }
  func.func @transform_2(%arg0: i32) -> (i32, i32) {
    %c0_i32 = arith.constant 0 : i32
    %c0_i32_0 = arith.constant 0 : i32
    return %arg0, %c0_i32 : i32, i32
  }
  func.func @transform_3(%arg0: i32) -> (i32, i32) {
    %c0_i32 = arith.constant 0 : i32
    %c0_i32_0 = arith.constant 0 : i32
    %c0_i32_1 = arith.constant 0 : i32
    return %c0_i32, %c0_i32_0 : i32, i32
  }
  func.func @transform_4(%arg0: i32) -> (i32, i32) {
    %c0_i32 = arith.constant 0 : i32
    %c0_i32_0 = arith.constant 0 : i32
    return %arg0, %c0_i32 : i32, i32
  }
}

module attributes {stable_mosaic.version = 11 : i64} {
  func.func @_supcon_labels_kernel(%arg0: i32, %arg1: memref<8x1xi32, #tpu.memory_space<vmem>>, %arg2: memref<1x128xi32, #tpu.memory_space<vmem>>, %arg3: memref<8x128xf32, #tpu.memory_space<vmem>>, %arg4: memref<128x128xf32, #tpu.memory_space<vmem>>, %arg5: memref<8x128xf32, #tpu.memory_space<vmem>>) attributes {dimension_semantics = [#tpu.dimension_semantics<parallel>], iteration_bounds = array<i64: 1>, scalar_prefetch = 0 : i64, scratch_operands = 0 : i64, tpu.core_type = #tpu.core_type<tc>, window_params = [{transform_indices = @transform_0, window_bounds = array<i64: 8, 1>}, {pipeline_mode = #tpu.pipeline_mode<synchronous>, transform_indices = @transform_1, window_bounds = array<i64: 1, 128>}, {transform_indices = @transform_2, window_bounds = array<i64: 8, 128>}, {pipeline_mode = #tpu.pipeline_mode<synchronous>, transform_indices = @transform_3, window_bounds = array<i64: 128, 128>}, {transform_indices = @transform_4, window_bounds = array<i64: 8, 128>}]} {
    %c0 = arith.constant 0 : index
    %c0_0 = arith.constant 0 : index
    %0 = vector.load %arg1[%c0, %c0_0] : memref<8x1xi32, #tpu.memory_space<vmem>>, vector<8x1xi32>
    %1 = vector.shape_cast %0 : vector<8x1xi32> to vector<8x1xi32>
    %2 = vector.broadcast %1 : vector<8x1xi32> to vector<8x128xi32>
    %c0_1 = arith.constant 0 : index
    %c0_2 = arith.constant 0 : index
    %3 = vector.load %arg2[%c0_1, %c0_2] : memref<1x128xi32, #tpu.memory_space<vmem>>, vector<1x128xi32>
    %4 = vector.shape_cast %3 : vector<1x128xi32> to vector<1x128xi32>
    %5 = vector.broadcast %4 : vector<1x128xi32> to vector<8x128xi32>
    %6 = arith.cmpi eq, %2, %5 : vector<8x128xi32>
    %7 = arith.extui %6 : vector<8x128xi1> to vector<8x128xi32>
    %8 = arith.sitofp %7 : vector<8x128xi32> to vector<8x128xf32>
    %c0_3 = arith.constant 0 : index
    %c0_4 = arith.constant 0 : index
    %9 = vector.load %arg3[%c0_3, %c0_4] : memref<8x128xf32, #tpu.memory_space<vmem>>, vector<8x128xf32>
    %c0_5 = arith.constant 0 : index
    %c0_6 = arith.constant 0 : index
    %10 = vector.load %arg4[%c0_5, %c0_6] : memref<128x128xf32, #tpu.memory_space<vmem>>, vector<128x128xf32>
    %cst = arith.constant dense<0.000000e+00> : vector<8x128xf32>
    %11 = tpu.matmul %9, %10, %cst {dimension_numbers = #tpu.dot_dimension_numbers<[1], [0], [0], [1], [0, 0, 1, 1], [], []>} : vector<8x128xf32>, vector<128x128xf32>, vector<8x128xf32> -> vector<8x128xf32>
    %cst_7 = arith.constant 14.2857141 : f32
    %12 = vector.broadcast %cst_7 : f32 to vector<8x128xf32>
    %13 = arith.mulf %11, %12 : vector<8x128xf32>
    %14 = tpu.iota {dimensions = array<i32: 1>} : vector<1x128xi32>
    %c8_i32 = arith.constant 8 : i32
    %15 = vector.broadcast %c8_i32 : i32 to vector<1x128xi32>
    %16 = arith.cmpi slt, %14, %15 : vector<1x128xi32>
    %17 = vector.shape_cast %16 : vector<1x128xi1> to vector<1x128xi1>
    %18 = vector.broadcast %17 : vector<1x128xi1> to vector<8x128xi1>
    %cst_8 = arith.constant dense<0xFF800000> : vector<8xf32>
    %19 = vector.multi_reduction <maximumf>, %13, %cst_8 [1] : vector<8x128xf32> to vector<8xf32>
    %20 = vector.shape_cast %19 : vector<8xf32> to vector<8x1xf32>
    %21 = vector.broadcast %20 : vector<8x1xf32> to vector<8x128xf32>
    %22 = arith.subf %13, %21 : vector<8x128xf32>
    %cst_9 = arith.constant 0.000000e+00 : f32
    %23 = vector.broadcast %cst_9 : f32 to vector<8x128xf32>
    %24 = arith.select %18, %22, %23 : vector<8x128xi1>, vector<8x128xf32>
    %cst_10 = arith.constant dense<0x7F800000> : vector<8xf32>
    %25 = vector.multi_reduction <minimumf>, %24, %cst_10 [1] : vector<8x128xf32> to vector<8xf32>
    %26 = vector.shape_cast %25 : vector<8xf32> to vector<8x1xf32>
    %cst_11 = arith.constant 0.000000e+00 : f32
    %27 = vector.broadcast %cst_11 : f32 to vector<8x1xf32>
    %28 = arith.subf %27, %26 : vector<8x1xf32>
    %29 = tpu.reciprocal %28 : vector<8x1xf32> -> vector<8x1xf32>
    %30 = vector.broadcast %26 : vector<8x1xf32> to vector<8x128xf32>
    %31 = arith.subf %22, %30 : vector<8x128xf32>
    %32 = vector.broadcast %29 : vector<8x1xf32> to vector<8x128xf32>
    %33 = arith.mulf %31, %32 : vector<8x128xf32>
    %34 = math.exp %33 : vector<8x128xf32>
    %cst_12 = arith.constant 0.000000e+00 : f32
    %35 = vector.broadcast %cst_12 : f32 to vector<8x128xf32>
    %36 = arith.select %18, %34, %35 : vector<8x128xi1>, vector<8x128xf32>
    %cst_13 = arith.constant dense<0.000000e+00> : vector<8xf32>
    %37 = vector.multi_reduction <add>, %36, %cst_13 [1] : vector<8x128xf32> to vector<8xf32>
    %38 = vector.shape_cast %37 : vector<8xf32> to vector<8x1xf32>
    %cst_14 = arith.constant 2.71828175 : f32
    %39 = vector.broadcast %cst_14 : f32 to vector<8x1xf32>
    %40 = arith.subf %38, %39 : vector<8x1xf32>
    %41 = math.log %40 : vector<8x1xf32>
    %cst_15 = arith.constant dense<0.000000e+00> : vector<8xf32>
    %42 = vector.multi_reduction <add>, %8, %cst_15 [1] : vector<8x128xf32> to vector<8xf32>
    %43 = vector.shape_cast %42 : vector<8xf32> to vector<8x1xf32>
    %44 = arith.mulf %8, %33 : vector<8x128xf32>
    %cst_16 = arith.constant dense<0.000000e+00> : vector<8xf32>
    %45 = vector.multi_reduction <add>, %44, %cst_16 [1] : vector<8x128xf32> to vector<8xf32>
    %46 = vector.shape_cast %45 : vector<8xf32> to vector<8x1xf32>
    %cst_17 = arith.constant 1.000000e+00 : f32
    %47 = vector.broadcast %cst_17 : f32 to vector<8x1xf32>
    %48 = arith.subf %43, %47 : vector<8x1xf32>
    %cst_18 = arith.constant 1.000000e+00 : f32
    %49 = vector.broadcast %cst_18 : f32 to vector<8x1xf32>
    %50 = arith.subf %46, %49 : vector<8x1xf32>
    %51 = arith.mulf %41, %48 : vector<8x1xf32>
    %52 = arith.subf %50, %51 : vector<8x1xf32>
    %cst_19 = arith.constant 1.000000e+00 : f32
    %53 = vector.broadcast %cst_19 : f32 to vector<8x1xf32>
    %54 = arith.addf %48, %53 : vector<8x1xf32>
    %55 = tpu.reciprocal %54 {approx = true} : vector<8x1xf32> -> vector<8x1xf32>
    %56 = arith.mulf %52, %55 : vector<8x1xf32>
    %cst_20 = arith.constant -1.000000e+00 : f32
    %57 = vector.broadcast %cst_20 : f32 to vector<8x1xf32>
    %58 = arith.mulf %57, %56 : vector<8x1xf32>
    %59 = vector.shape_cast %58 : vector<8x1xf32> to vector<8x1xf32>
    %60 = vector.broadcast %59 : vector<8x1xf32> to vector<8x128xf32>
    %c0_21 = arith.constant 0 : index
    %c0_22 = arith.constant 0 : index
    %61 = vector.load %arg5[%c0_21, %c0_22] : memref<8x128xf32, #tpu.memory_space<vmem>>, vector<8x128xf32>
    tpu.vector_store %arg5[%c0_21, %c0_22], %60 {strides = array<i32>} : memref<8x128xf32, #tpu.memory_space<vmem>>, vector<8x128xf32>,
    return
  }
  func.func @transform_0(%arg0: i32) -> (i32, i32) {
    %c0_i32 = arith.constant 0 : i32
    %c0_i32_0 = arith.constant 0 : i32
    return %arg0, %c0_i32 : i32, i32
  }
  func.func @transform_1(%arg0: i32) -> (i32, i32) {
    %c0_i32 = arith.constant 0 : i32
    %c0_i32_0 = arith.constant 0 : i32
    %c0_i32_1 = arith.constant 0 : i32
    return %c0_i32, %c0_i32_0 : i32, i32
  }
  func.func @transform_2(%arg0: i32) -> (i32, i32) {
    %c0_i32 = arith.constant 0 : i32
    %c0_i32_0 = arith.constant 0 : i32
    return %arg0, %c0_i32 : i32, i32
  }
  func.func @transform_3(%arg0: i32) -> (i32, i32) {
    %c0_i32 = arith.constant 0 : i32
    %c0_i32_0 = arith.constant 0 : i32
    %c0_i32_1 = arith.constant 0 : i32
    return %c0_i32, %c0_i32_0 : i32, i32
  }
  func.func @transform_4(%arg0: i32) -> (i32, i32) {
    %c0_i32 = arith.constant 0 : i32
    %c0_i32_0 = arith.constant 0 : i32
    return %arg0, %c0_i32 : i32, i32
  }
}

</mosaic_0001>

<bundles_post_ra>
// kernel: tpu_custom_call.1
= control target key start
LH: loop header
LB: loop body
LE: loop exit
PB: predicated region body
PF: predicated region fallthrough
CT: control target
= control target key end

     0   :  { %9 = vsyncpa [#allocation3], 0  ;;  %s399_s0 = inlined_call_operand.vmem [shape: s32[8,1], index: 0, kind: input, shape index: {}]   ;;  %s400_s1 = inlined_call_operand.vmem [shape: s32[1,128], index: 1, kind: input, shape index: {}]   ;;  %s401_s2 = inlined_call_operand.vmem [shape: f32[8,128], index: 2, kind: input, shape index: {}]   ;;  %s402_s3 = inlined_call_operand.hbm [shape: f32[128,128], index: 3, kind: input, shape index: {}]   ;;  %s403_s4 = inlined_call_operand.hbm [shape: f32[8,128], index: 4, kind: output, shape index: {}]  }
   0x1   :  { %10 = vsyncpa [#allocation4], 0  ;;  %s331_s15 = smov [#allocation2]   ;;  %s283_s19 = scalar_lea.hbm %s402_s3, 2048 }
   0x2   :  { %s22_s16 = sshll.u32 %s331_s15, 4  ;;  %p284_p0 = scmp.ne.s32.totalorder %s402_s3, %s283_s19  ;;  %s23_s16 = int_to_ptr.vmem [resolvable:$true] %s22_s16 }
   0x3   :  { %p287_p1 = scmp.lt.u32.totalorder %s283_s19, %s402_s3 }
   0x5   :  { %p289_p2 = pnand %p287_p1, %p284_p0 }
   0x7   :  { %292 = shalt.err (!%p289_p2)
}
   0x8   :  { %s293_s24 = scalar_lea.vmem %s23_s16, 2048  ;;  %p298_p4 = scmp.lt.s32.totalorder %s23_s16, %s23_s16 }
   0x9   :  { %p294_p3 = scmp.ne.s32.totalorder %s23_s16, %s293_s24  ;;  %p299_p5 = scmp.lt.s32.totalorder %s293_s24, %s293_s24 }
   0xb   :  { %p300_p6 = por %p299_p5, %p298_p4 }
   0xd   :  { %p301_p7 = pnand %p300_p6, %p294_p3 }
   0xf   :  { %304 = shalt.err (!%p301_p7)
}
  0x10   :  { %s332_s25 = smov 128   ;;  %s333_s26 = smov 8  }
  0x11   :  { %28 = dma.hbm_to_vmem [thread:$0]  %s402_s3, 2048, %s23_s16, [#allocation3], %s332_s25, %s332_s25, %s333_s26  }
  0x12   :  { %327 = dma.done.wait [#allocation3], 2048  }
  0x13   :  { %328 = vsyncadd [#allocation3], 4294965248  ;;  %v334_v0 = vmov 0.0|0.0   ;;  %vm335_vm0 = vmmov 0   ;;  %v336_v1 = vmov 0.0   ;;  %v45_v2 = vld [vmem:[#allocation2] sm:$0xff]  ;;  %v132_v32 = vlaneseq }
  0x14   :  { %241 = vmatprep.subr.bf16.mxu0 %v334_v0  ;;  %238 = vmatprep.mubr.msk.f32.mxu0 %vm335_vm0, %v336_v1  ;;  %v46_v3 = vld [vmem:[#allocation2 + $0x8] sm:$0xff]  ;;  %v47_v4 = vld [vmem:[#allocation2 + $0x10] sm:$0xff]  ;;  %v48_v6 = vld [vmem:[#allocation2 + $0x18] sm:$0xff]  ;;  %v337_v31 = vmov 0  }
  0x15   :  { %v242_v5 = vpack.c.bf16 %v46_v3, %v45_v2  ;;  %v245_v7 = vpack.c.bf16 %v48_v6, %v47_v4  ;;  %v49_v8 = vld [vmem:[#allocation2 + $0x20] sm:$0xff]  ;;  %v50_v9 = vld [vmem:[#allocation2 + $0x28] sm:$0xff]  ;;  %v51_v11 = vld [vmem:[#allocation2 + $0x30] sm:$0xff]  ;;  %273 = vset.pattern.permute.xlu1 %v337_v31  ;;  %274 = vset.pattern.permute.xlu0 %v337_v31  ;;  %v133_v33 = vand.u32 127, %v132_v32 }
  0x16   :  { %v248_v10 = vpack.c.bf16 %v50_v9, %v49_v8  ;;  %v52_v12 = vld [vmem:[#allocation2 + $0x38] sm:$0xff]  ;;  %v53_v14 = vld [vmem:[#allocation2 + $0x40] sm:$0xff]  ;;  %v54_v15 = vld [vmem:[#allocation2 + $0x48] sm:$0xff] }
  0x17   :  { %243 = vmatpush3.bf16.msra.mxu0 %v242_v5  ;;  %v251_v13 = vpack.c.bf16 %v52_v12, %v51_v11  ;;  %v254_v16 = vpack.c.bf16 %v54_v15, %v53_v14  ;;  %v55_v17 = vld [vmem:[#allocation2 + $0x50] sm:$0xff]  ;;  %v56_v18 = vld [vmem:[#allocation2 + $0x58] sm:$0xff]  ;;  %v57_v20 = vld [vmem:[#allocation2 + $0x60] sm:$0xff]  ;;  %vm134_vm1 = vcmp.lt.s32.totalorder %v133_v33, 8 }
  0x18   :  { %244 = vmatprep.subr.bf16.mxu0 %v334_v0  ;;  %v257_v19 = vpack.c.bf16 %v56_v18, %v55_v17  ;;  %v58_v21 = vld [vmem:[#allocation2 + $0x68] sm:$0xff]  ;;  %v59_v23 = vld [vmem:[#allocation2 + $0x70] sm:$0xff]  ;;  %v60_v24 = vld [vmem:[#allocation2 + $0x78] sm:$0xff] }
  0x19   :  { %v260_v22 = vpack.c.bf16 %v58_v21, %v57_v20  ;;  %v263_v25 = vpack.c.bf16 %v60_v24, %v59_v23  ;;  %v44_v26 = vld [vmem:[%s401_s2] sm:$0xff] }
  0x1a   :  { %v32_v30 = vld [vmem:[%s399_s0] sm:$0xff]  ;;  %s338_s0 = smov [#allocation5]  }
  0x1b   :  { %246 = vmatpush3.bf16.msra.mxu0 %v245_v7  ;;  %34 = vperm.xlu1 %273, %v32_v30   ;;  %v184_v37 = vld [vmem:[%s400_s1] ss:$0 sm:$0xff]  ;;  %s175_s1 = sshll.u32 %s338_s0, 4  ;;  %s176_s1 = int_to_ptr.vmem [resolvable:$true] %s175_s1 }
  0x1c   :  { %247 = vmatprep.subr.bf16.mxu0 %v334_v0  ;;  %s305_s7 = scalar_lea.vmem %s176_s1, 128  ;;  %p310_p9 = scmp.lt.s32.totalorder %s176_s1, %s176_s1 }
  0x1d   :  { %p306_p8 = scmp.ne.s32.totalorder %s176_s1, %s305_s7  ;;  %p311_p10 = scmp.lt.s32.totalorder %s305_s7, %s305_s7 }
  0x1f   :  { %249 = vmatpush3.bf16.msra.mxu0 %v248_v10  ;;  %p312_p11 = por %p311_p10, %p310_p9 }
  0x20   :  { %250 = vmatprep.subr.bf16.mxu0 %v334_v0 }
  0x21   :  { %p313_p12 = pnand %p312_p11, %p306_p8 }
  0x23   :  { %252 = vmatpush3.bf16.msra.mxu0 %v251_v13 }
  0x24   :  { %253 = vmatprep.subr.bf16.mxu0 %v334_v0 }
  0x27   :  { %255 = vmatpush3.bf16.msra.mxu0 %v254_v16 }
  0x28   :  { %256 = vmatprep.subr.bf16.mxu0 %v334_v0 }
  0x2b   :  { %258 = vmatpush3.bf16.msra.mxu0 %v257_v19 }
  0x2c   :  { %259 = vmatprep.subr.bf16.mxu0 %v334_v0 }
  0x2f   :  { %261 = vmatpush3.bf16.msra.mxu0 %v260_v22 }
  0x30   :  { %262 = vmatprep.subr.bf16.mxu0 %v334_v0 }
  0x33   :  { %264 = vmatpush3.bf16.msra.mxu0 %v263_v25 }
  0x36   :  { %239 = vmatmul.mubr.f32.vlgmr.msra.gmra.mrb[0].mxu0 %v44_v26 }
  0x9a   :  { %v35_v38 = vpop.permute.xlu1 %34 }
  0x9b   :  { %vm41_vm2 = vcmp.eq.s32.totalorder %v35_v38, %v184_v37 }
  0x9c   :  { %v185_v39 = vsel %vm41_vm2, 1.0, %v336_v1 }
 0x109   :  { %v127_v27 = vpop.f32.mrb[0].mxu0 }
 0x10a   :  { %v131_v28 = vmul.f32 14.285714, %v127_v27  ;;  %v240_v29 = vpop.f32.mrb[1].mxu0 }
 0x10c   :  { %137 = vmax.xlane.f32.xlu0 %v131_v28 }
 0x199   :  { %v138_v34 = vpop.xlane.xlu0 %137 }
 0x19a   :  { %v139_v35 = vsub.f32 %v131_v28, %v138_v34 }
 0x19c   :  { %v140_v36 = vsel %vm134_vm1, %v139_v35, 0.0 }
 0x19d   :  { %141 = vmin.xlane.f32.xlu0 %v140_v36 }
 0x1a1   :  { %155 = vadd.xlane.f32.xlu0 %v185_v39 }
 0x22a   :  { %v142_v40 = vpop.xlane.xlu0 %141 }
 0x22b   :  { %v143_v41 = vsub.f32 0.0, %v142_v40  ;;  %v145_v42 = vsub.f32 %v139_v35, %v142_v40 }
 0x22d   :  { %275 = vrcp.f32 %v143_v41 }
 0x22e   :  { %v156_v49 = vpop.xlane.xlu0 %155 }
 0x22f   :  { %v187_v50 = vadd.f32 -1.0, %v156_v49 }
 0x231   :  { %v164_v53 = vadd.f32 1.0, %v187_v50 }
 0x237   :  { %v276_v43 = vpop.eup %275 }
 0x238   :  { %v146_v44 = vmul.f32 %v276_v43, %v145_v42 }
 0x23a   :  { %v147_v45 = vmul.f32 1.442695, %v146_v44  ;;  %v157_v46 = vmul.f32 %v185_v39, %v146_v44 }
 0x23c   :  { %277 = vpow2.f32 %v147_v45  ;;  %158 = vadd.xlane.f32.xlu0 %v157_v46 }
 0x246   :  { %v278_v47 = vpop.eup %277 }
 0x247   :  { %v149_v48 = vsel %vm134_vm1, %v278_v47, 0.0 }
 0x248   :  { %150 = vadd.xlane.f32.xlu1 %v149_v48 }
 0x2c9   :  { %v159_v55 = vpop.xlane.xlu0 %158 }
 0x2ca   :  { %v188_v57 = vadd.f32 -1.0, %v159_v55 }
 0x2d5   :  { %v151_v51 = vpop.xlane.xlu1 %150 }
 0x2d6   :  { %v186_v52 = vadd.f32 -2.7182817, %v151_v51 }
 0x2d8   :  { %279 = vlog2.f32 %v186_v52 }
 0x2d9   :  { %281 = vrcp.f32 %v164_v53 }
 0x2e2   :  { %v280_v54 = vpop.eup %279 }
 0x2e3   :  { %v154_v56 = vmul.f32 0.6931472, %v280_v54  ;;  %v282_v59 = vpop.eup %281 }
 0x2e5   :  { %v162_v58 = vmul.f32 %v187_v50, %v154_v56 }
 0x2e7   :  { %v163_v60 = vsub.f32 %v188_v57, %v162_v58 }
 0x2e9   :  { %v166_v61 = vmul.f32 %v282_v59, %v163_v60 }
 0x2eb   :  { %v167_v62 = vmul.f32 -1.0, %v166_v61 }
 0x2ed   :  { %168 = vst [vmem:[#allocation5] sm:$0xff] %v167_v62 }
 0x2ee   :  { %316 = shalt.err (!%p313_p12)
}
 0x2ef   :  { %s317_s10 = scalar_lea.hbm %s403_s4, 128 }
 0x2f0   :  { %p318_p13 = scmp.ne.s32.totalorder %s403_s4, %s317_s10  ;;  %p321_p0 = scmp.lt.u32.totalorder %s317_s10, %s403_s4 }
 0x2f2   :  { %p323_p1 = pnand %p321_p0, %p318_p13 }
 0x2f4   :  { %326 = shalt.err (!%p323_p1)
}
 0x2f5   :  { %178 = dma.vmem_to_hbm [thread:$0]  %s176_s1, 128, %s403_s4, [#allocation4]  }
 0x2f6   :  { %329 = dma.done.wait [#allocation4], 128  }
 0x2f7   :  { %330 = vsyncadd [#allocation4], 4294967168 }
 0x2f8   :  { %182 = vsyncpa [#allocation3], 1 }
 0x2f9   :  { %183 = vsyncpa [#allocation4], 1 }

// kernel: tpu_custom_call.1
= control target key start
LH: loop header
LB: loop body
LE: loop exit
PB: predicated region body
PF: predicated region fallthrough
CT: control target
= control target key end

     0   :  { %9 = vsyncpa [#allocation3], 0  ;;  %s399_s0 = inlined_call_operand.vmem [shape: s32[8,1], index: 0, kind: input, shape index: {}]   ;;  %s400_s1 = inlined_call_operand.vmem [shape: s32[1,128], index: 1, kind: input, shape index: {}]   ;;  %s401_s2 = inlined_call_operand.vmem [shape: f32[8,128], index: 2, kind: input, shape index: {}]   ;;  %s402_s3 = inlined_call_operand.hbm [shape: f32[128,128], index: 3, kind: input, shape index: {}]   ;;  %s403_s4 = inlined_call_operand.hbm [shape: f32[8,128], index: 4, kind: output, shape index: {}]  }
   0x1   :  { %10 = vsyncpa [#allocation4], 0  ;;  %s331_s15 = smov [#allocation2]   ;;  %s283_s19 = scalar_lea.hbm %s402_s3, 2048 }
   0x2   :  { %s22_s16 = sshll.u32 %s331_s15, 4  ;;  %p284_p0 = scmp.ne.s32.totalorder %s402_s3, %s283_s19  ;;  %s23_s16 = int_to_ptr.vmem [resolvable:$true] %s22_s16 }
   0x3   :  { %p287_p1 = scmp.lt.u32.totalorder %s283_s19, %s402_s3 }
   0x5   :  { %p289_p2 = pnand %p287_p1, %p284_p0 }
   0x7   :  { %292 = shalt.err (!%p289_p2)
}
   0x8   :  { %s293_s24 = scalar_lea.vmem %s23_s16, 2048  ;;  %p298_p4 = scmp.lt.s32.totalorder %s23_s16, %s23_s16 }
   0x9   :  { %p294_p3 = scmp.ne.s32.totalorder %s23_s16, %s293_s24  ;;  %p299_p5 = scmp.lt.s32.totalorder %s293_s24, %s293_s24 }
   0xb   :  { %p300_p6 = por %p299_p5, %p298_p4 }
   0xd   :  { %p301_p7 = pnand %p300_p6, %p294_p3 }
   0xf   :  { %304 = shalt.err (!%p301_p7)
}
  0x10   :  { %s332_s25 = smov 128   ;;  %s333_s26 = smov 8  }
  0x11   :  { %28 = dma.hbm_to_vmem [thread:$0]  %s402_s3, 2048, %s23_s16, [#allocation3], %s332_s25, %s332_s25, %s333_s26  }
  0x12   :  { %327 = dma.done.wait [#allocation3], 2048  }
  0x13   :  { %328 = vsyncadd [#allocation3], 4294965248  ;;  %v334_v0 = vmov 0.0|0.0   ;;  %vm335_vm0 = vmmov 0   ;;  %v336_v1 = vmov 0.0   ;;  %v45_v2 = vld [vmem:[#allocation2] sm:$0xff]  ;;  %v132_v32 = vlaneseq }
  0x14   :  { %241 = vmatprep.subr.bf16.mxu0 %v334_v0  ;;  %238 = vmatprep.mubr.msk.f32.mxu0 %vm335_vm0, %v336_v1  ;;  %v46_v3 = vld [vmem:[#allocation2 + $0x8] sm:$0xff]  ;;  %v47_v4 = vld [vmem:[#allocation2 + $0x10] sm:$0xff]  ;;  %v48_v6 = vld [vmem:[#allocation2 + $0x18] sm:$0xff]  ;;  %v337_v31 = vmov 0  }
  0x15   :  { %v242_v5 = vpack.c.bf16 %v46_v3, %v45_v2  ;;  %v245_v7 = vpack.c.bf16 %v48_v6, %v47_v4  ;;  %v49_v8 = vld [vmem:[#allocation2 + $0x20] sm:$0xff]  ;;  %v50_v9 = vld [vmem:[#allocation2 + $0x28] sm:$0xff]  ;;  %v51_v11 = vld [vmem:[#allocation2 + $0x30] sm:$0xff]  ;;  %273 = vset.pattern.permute.xlu1 %v337_v31  ;;  %274 = vset.pattern.permute.xlu0 %v337_v31  ;;  %v133_v33 = vand.u32 127, %v132_v32 }
  0x16   :  { %v248_v10 = vpack.c.bf16 %v50_v9, %v49_v8  ;;  %v52_v12 = vld [vmem:[#allocation2 + $0x38] sm:$0xff]  ;;  %v53_v14 = vld [vmem:[#allocation2 + $0x40] sm:$0xff]  ;;  %v54_v15 = vld [vmem:[#allocation2 + $0x48] sm:$0xff] }
  0x17   :  { %243 = vmatpush3.bf16.msra.mxu0 %v242_v5  ;;  %v251_v13 = vpack.c.bf16 %v52_v12, %v51_v11  ;;  %v254_v16 = vpack.c.bf16 %v54_v15, %v53_v14  ;;  %v55_v17 = vld [vmem:[#allocation2 + $0x50] sm:$0xff]  ;;  %v56_v18 = vld [vmem:[#allocation2 + $0x58] sm:$0xff]  ;;  %v57_v20 = vld [vmem:[#allocation2 + $0x60] sm:$0xff]  ;;  %vm134_vm1 = vcmp.lt.s32.totalorder %v133_v33, 8 }
  0x18   :  { %244 = vmatprep.subr.bf16.mxu0 %v334_v0  ;;  %v257_v19 = vpack.c.bf16 %v56_v18, %v55_v17  ;;  %v58_v21 = vld [vmem:[#allocation2 + $0x68] sm:$0xff]  ;;  %v59_v23 = vld [vmem:[#allocation2 + $0x70] sm:$0xff]  ;;  %v60_v24 = vld [vmem:[#allocation2 + $0x78] sm:$0xff] }
  0x19   :  { %v260_v22 = vpack.c.bf16 %v58_v21, %v57_v20  ;;  %v263_v25 = vpack.c.bf16 %v60_v24, %v59_v23  ;;  %v44_v26 = vld [vmem:[%s401_s2] sm:$0xff] }
  0x1a   :  { %v32_v30 = vld [vmem:[%s399_s0] sm:$0xff]  ;;  %s338_s0 = smov [#allocation5]  }
  0x1b   :  { %246 = vmatpush3.bf16.msra.mxu0 %v245_v7  ;;  %34 = vperm.xlu1 %273, %v32_v30   ;;  %v184_v37 = vld [vmem:[%s400_s1] ss:$0 sm:$0xff]  ;;  %s175_s1 = sshll.u32 %s338_s0, 4  ;;  %s176_s1 = int_to_ptr.vmem [resolvable:$true] %s175_s1 }
  0x1c   :  { %247 = vmatprep.subr.bf16.mxu0 %v334_v0  ;;  %s305_s7 = scalar_lea.vmem %s176_s1, 128  ;;  %p310_p9 = scmp.lt.s32.totalorder %s176_s1, %s176_s1 }
  0x1d   :  { %p306_p8 = scmp.ne.s32.totalorder %s176_s1, %s305_s7  ;;  %p311_p10 = scmp.lt.s32.totalorder %s305_s7, %s305_s7 }
  0x1f   :  { %249 = vmatpush3.bf16.msra.mxu0 %v248_v10  ;;  %p312_p11 = por %p311_p10, %p310_p9 }
  0x20   :  { %250 = vmatprep.subr.bf16.mxu0 %v334_v0 }
  0x21   :  { %p313_p12 = pnand %p312_p11, %p306_p8 }
  0x23   :  { %252 = vmatpush3.bf16.msra.mxu0 %v251_v13 }
  0x24   :  { %253 = vmatprep.subr.bf16.mxu0 %v334_v0 }
  0x27   :  { %255 = vmatpush3.bf16.msra.mxu0 %v254_v16 }
  0x28   :  { %256 = vmatprep.subr.bf16.mxu0 %v334_v0 }
  0x2b   :  { %258 = vmatpush3.bf16.msra.mxu0 %v257_v19 }
  0x2c   :  { %259 = vmatprep.subr.bf16.mxu0 %v334_v0 }
  0x2f   :  { %261 = vmatpush3.bf16.msra.mxu0 %v260_v22 }
  0x30   :  { %262 = vmatprep.subr.bf16.mxu0 %v334_v0 }
  0x33   :  { %264 = vmatpush3.bf16.msra.mxu0 %v263_v25 }
  0x36   :  { %239 = vmatmul.mubr.f32.vlgmr.msra.gmra.mrb[0].mxu0 %v44_v26 }
  0x9a   :  { %v35_v38 = vpop.permute.xlu1 %34 }
  0x9b   :  { %vm41_vm2 = vcmp.eq.s32.totalorder %v35_v38, %v184_v37 }
  0x9c   :  { %v185_v39 = vsel %vm41_vm2, 1.0, %v336_v1 }
 0x109   :  { %v127_v27 = vpop.f32.mrb[0].mxu0 }
 0x10a   :  { %v131_v28 = vmul.f32 14.285714, %v127_v27  ;;  %v240_v29 = vpop.f32.mrb[1].mxu0 }
 0x10c   :  { %137 = vmax.xlane.f32.xlu0 %v131_v28 }
 0x199   :  { %v138_v34 = vpop.xlane.xlu0 %137 }
 0x19a   :  { %v139_v35 = vsub.f32 %v131_v28, %v138_v34 }
 0x19c   :  { %v140_v36 = vsel %vm134_vm1, %v139_v35, 0.0 }
 0x19d   :  { %141 = vmin.xlane.f32.xlu0 %v140_v36 }
 0x1a1   :  { %155 = vadd.xlane.f32.xlu0 %v185_v39 }
 0x22a   :  { %v142_v40 = vpop.xlane.xlu0 %141 }
 0x22b   :  { %v143_v41 = vsub.f32 0.0, %v142_v40  ;;  %v145_v42 = vsub.f32 %v139_v35, %v142_v40 }
 0x22d   :  { %275 = vrcp.f32 %v143_v41 }
 0x22e   :  { %v156_v49 = vpop.xlane.xlu0 %155 }
 0x22f   :  { %v187_v50 = vadd.f32 -1.0, %v156_v49 }
 0x231   :  { %v164_v53 = vadd.f32 1.0, %v187_v50 }
 0x237   :  { %v276_v43 = vpop.eup %275 }
 0x238   :  { %v146_v44 = vmul.f32 %v276_v43, %v145_v42 }
 0x23a   :  { %v147_v45 = vmul.f32 1.442695, %v146_v44  ;;  %v157_v46 = vmul.f32 %v185_v39, %v146_v44 }
 0x23c   :  { %277 = vpow2.f32 %v147_v45  ;;  %158 = vadd.xlane.f32.xlu0 %v157_v46 }
 0x246   :  { %v278_v47 = vpop.eup %277 }
 0x247   :  { %v149_v48 = vsel %vm134_vm1, %v278_v47, 0.0 }
 0x248   :  { %150 = vadd.xlane.f32.xlu1 %v149_v48 }
 0x2c9   :  { %v159_v55 = vpop.xlane.xlu0 %158 }
 0x2ca   :  { %v188_v57 = vadd.f32 -1.0, %v159_v55 }
 0x2d5   :  { %v151_v51 = vpop.xlane.xlu1 %150 }
 0x2d6   :  { %v186_v52 = vadd.f32 -2.7182817, %v151_v51 }
 0x2d8   :  { %279 = vlog2.f32 %v186_v52 }
 0x2d9   :  { %281 = vrcp.f32 %v164_v53 }
 0x2e2   :  { %v280_v54 = vpop.eup %279 }
 0x2e3   :  { %v154_v56 = vmul.f32 0.6931472, %v280_v54  ;;  %v282_v59 = vpop.eup %281 }
 0x2e5   :  { %v162_v58 = vmul.f32 %v187_v50, %v154_v56 }
 0x2e7   :  { %v163_v60 = vsub.f32 %v188_v57, %v162_v58 }
 0x2e9   :  { %v166_v61 = vmul.f32 %v282_v59, %v163_v60 }
 0x2eb   :  { %v167_v62 = vmul.f32 -1.0, %v166_v61 }
 0x2ed   :  { %168 = vst [vmem:[#allocation5] sm:$0xff] %v167_v62 }
 0x2ee   :  { %316 = shalt.err (!%p313_p12)
}
 0x2ef   :  { %s317_s10 = scalar_lea.hbm %s403_s4, 128 }
 0x2f0   :  { %p318_p13 = scmp.ne.s32.totalorder %s403_s4, %s317_s10  ;;  %p321_p0 = scmp.lt.u32.totalorder %s317_s10, %s403_s4 }
 0x2f2   :  { %p323_p1 = pnand %p321_p0, %p318_p13 }
 0x2f4   :  { %326 = shalt.err (!%p323_p1)
}
 0x2f5   :  { %178 = dma.vmem_to_hbm [thread:$0]  %s176_s1, 128, %s403_s4, [#allocation4]  }
 0x2f6   :  { %329 = dma.done.wait [#allocation4], 128  }
 0x2f7   :  { %330 = vsyncadd [#allocation4], 4294967168 }
 0x2f8   :  { %182 = vsyncpa [#allocation3], 1 }
 0x2f9   :  { %183 = vsyncpa [#allocation4], 1 }

</bundles_post_ra>
